<compile_context>
chip_gen: v7x
topology: tpu7x:2x2x1
jax: 0.10.0
libtpu: 0.0.40
codegen_flags: <defaults>
</compile_context>

<pallas_src>
import functools

import jax
import jax.numpy as jnp
from jax import lax
from jax.experimental import pallas as pl
from jax.experimental.pallas import tpu as pltpu

_LSTM_HIDDEN = 10
_HG = 16  # LSTM gate block padded to a sublane-aligned height (10 -> 16)


# ----------------------------------------------------------------------------
# In-kernel helpers (exp-based transcendentals: guaranteed EUP lowering)
# ----------------------------------------------------------------------------
def _sigmoid(x):
    return 1.0 / (1.0 + jnp.exp(-x))


def _tanh(x):
    return 2.0 / (1.0 + jnp.exp(-2.0 * x)) - 1.0


# ----------------------------------------------------------------------------
# Fused kernel: one grid step == one batch sample.
# ----------------------------------------------------------------------------
def _adapt_conv2d_kernel(x_ref, w_ref, masks_ref, sel_ref, cgb_ref,
                         lgw_ref, lgb_ref, lstmw_ref, lstmb_ref,
                         fcw_ref, fcb_ref, cgfw_ref, cgfb_ref,
                         out_ref, layer_ref, chan_ref,
                         patches_ref, *, H, W, C_pad):
    HW = H * W
    x = x_ref[0]                                             # (C_pad, HW) f32

    # ---- nine shifted+masked 3x3 taps, built ONCE into the shared scratch --
    # Tap (kh, kw) at flattened pixel p equals x[:, p + dh*W + dw] (zero
    # outside the image): a lane roll plus one multiply by a precomputed mask.
    for k in range(9):
        dh, dw = k // 3 - 1, k % 3 - 1
        shift = (-(dh * W + dw)) % HW                        # out[p] = x[p + dh*W + dw]
        t = pltpu.roll(x, shift, axis=1) if shift else x
        patches_ref[k * C_pad:(k + 1) * C_pad, :] = t * masks_ref[k]

    # ---- ChannelGate conv + main conv in ONE stacked MXU matmul ------------
    conv = jnp.dot(w_ref[...], patches_ref[...],
                   preferred_element_type=jnp.float32)       # (2*C_pad, HW)
    gate_conv = jnp.maximum(conv[0:C_pad, :] + cgb_ref[...], 0.0)
    main_conv = conv[C_pad:2 * C_pad, :]

    # ---- LayerGate: GAP -> 1x1 conv -> ReLU -> LSTM(seq=1, h0=c0=0) -> FC --
    gap = jnp.mean(x, axis=1, keepdims=True)                 # (C_pad, 1)
    y = jnp.maximum(jnp.sum(lgw_ref[...] * gap, axis=0, keepdims=True)
                    + lgb_ref[...], 0.0)                     # (1, 10)
    g = (jnp.sum(lstmw_ref[...] * y, axis=1, keepdims=True)
         + lstmb_ref[...])                                   # (4*_HG, 1)
    i_g = _sigmoid(g[0:_HG])                # forget gate unused since c0 == 0
    g_g = _tanh(g[2 * _HG:3 * _HG])
    o_g = _sigmoid(g[3 * _HG:4 * _HG])
    h = o_g * _tanh(i_g * g_g)                               # (_HG, 1)
    z_l = jnp.sum(fcw_ref[...] * h, axis=0, keepdims=True) + fcb_ref[...]  # (1,1)
    # round(sigmoid(relu(z))) == (z > 0) (round-half-to-even sends 0.5 -> 0).
    layer_gate = (z_l > 0.0).astype(jnp.float32)             # (1, 1)

    # ---- ChannelGate: masked mean over stride-2/VALID centers -> FC --------
    cgf = jnp.sum(gate_conv * sel_ref[...], axis=1, keepdims=True)  # (C_pad,1)
    z_c = (jnp.sum(cgfw_ref[...] * cgf, axis=0, keepdims=True)
           + cgfb_ref[...])                                  # (1, C_pad)
    chan_row = (z_c > 0.0).astype(jnp.float32)               # (1, C_pad)

    # Row -> column without a transpose: identity mask + lane reduce.
    eye = (lax.broadcasted_iota(jnp.int32, (C_pad, C_pad), 0) ==
           lax.broadcasted_iota(jnp.int32, (C_pad, C_pad), 1)).astype(jnp.float32)
    chan_col = jnp.sum(eye * chan_row, axis=1, keepdims=True)       # (C_pad, 1)

    # ---- gated blend; eff == 0 reproduces the per-sample skip exactly ------
    eff = chan_col * layer_gate                              # (C_pad, 1)
    out_ref[0] = (eff * main_conv + (1.0 - eff) * x).astype(out_ref.dtype)
    layer_ref[0] = layer_gate
    chan_ref[0] = chan_row


# ----------------------------------------------------------------------------
# Wrapper-side precompute (masks, weight fusion/padding) + pallas_call plumbing
# ----------------------------------------------------------------------------
def _fuse_conv_weight(w):
    # (Cout, Cin, 3, 3) -> (Cout, 9*Cin); column order (kh, kw, cin) matches
    # the tap rows written into the patches scratch.
    cout, cin = w.shape[0], w.shape[1]
    return jnp.transpose(w, (0, 2, 3, 1)).reshape(cout, 9 * cin)


def _precompute_masks(H, W):
    HW = H * W
    r = jnp.arange(HW, dtype=jnp.int32) // W
    c = jnp.arange(HW, dtype=jnp.int32) % W
    taps = []
    for kh in range(3):
        for kw in range(3):
            dh, dw = kh - 1, kw - 1
            taps.append((r + dh >= 0) & (r + dh < H) & (c + dw >= 0) & (c + dw < W))
    masks = jnp.stack(taps).astype(jnp.float32).reshape(9, 1, HW)
    # The stride-2 VALID ChannelGate conv equals the stride-1 SAME conv at the
    # odd-(row, col) centers (padding never reached there); pre-fold 1/(Hc*Wc).
    Hc, Wc = (H - 3) // 2 + 1, (W - 3) // 2 + 1
    sel = ((r % 2 == 1) & (c % 2 == 1) & (r <= 2 * Hc - 1) & (c <= 2 * Wc - 1))
    sel_scaled = (sel.astype(jnp.float32) / float(Hc * Wc)).reshape(1, HW)
    return masks, sel_scaled


def _prepare_operands(p, C, C_pad):
    f32 = jnp.float32

    def pad2(a, rows, cols):
        a = a.astype(f32)
        return jnp.pad(a, ((0, rows - a.shape[0]), (0, cols - a.shape[1])))

    def pad_conv(w):
        return jnp.pad(w.astype(f32),
                       ((0, C_pad - w.shape[0]), (0, C_pad - w.shape[1]),
                        (0, 0), (0, 0)))

    # Stack ChannelGate conv weights on top of the main conv weights.
    w_stack = jnp.concatenate(
        [_fuse_conv_weight(pad_conv(p['cg_conv_w'])),
         _fuse_conv_weight(pad_conv(p['conv_w']))], axis=0)      # (2C_pad, 9C_pad)
    cg_b = pad2(p['cg_conv_b'].reshape(C, 1), C_pad, 1)
    lg_w_t = pad2(p['lg_conv_w'].T, C_pad, _LSTM_HIDDEN)         # (C_pad, 10)
    lg_b = p['lg_conv_b'].reshape(1, _LSTM_HIDDEN).astype(f32)
    # LSTM: regroup the i/f/g/o blocks onto sublane-aligned 16-row boundaries
    # (torch order [i, f, g, o]); combined bias = b_ih + b_hh since h0 = 0.
    wih = p['lstm_w_ih'].astype(f32)
    bsum = (p['lstm_b_ih'] + p['lstm_b_hh']).astype(f32).reshape(4 * _LSTM_HIDDEN, 1)
    lstm_w = jnp.zeros((4 * _HG, _LSTM_HIDDEN), f32)
    lstm_b = jnp.zeros((4 * _HG, 1), f32)
    for q in range(4):
        lstm_w = lstm_w.at[q * _HG:q * _HG + _LSTM_HIDDEN].set(
            wih[q * _LSTM_HIDDEN:(q + 1) * _LSTM_HIDDEN])
        lstm_b = lstm_b.at[q * _HG:q * _HG + _LSTM_HIDDEN].set(
            bsum[q * _LSTM_HIDDEN:(q + 1) * _LSTM_HIDDEN])
    lg_fc_w = pad2(p['lg_fc_w'].T, _HG, 1)                       # (16, 1)
    lg_fc_b = p['lg_fc_b'].reshape(1, 1).astype(f32)
    cg_fc_w_t = pad2(p['cg_fc_w'].T, C_pad, C_pad)               # (C_pad, C_pad)
    cg_fc_b = pad2(p['cg_fc_b'].reshape(1, C), 1, C_pad)         # (1, C_pad)
    return (w_stack, cg_b, lg_w_t, lg_b, lstm_w, lstm_b, lg_fc_w, lg_fc_b,
            cg_fc_w_t, cg_fc_b)


def _batch_dim_semantics(B):
    # Only core_parallel actually changes codegen / engages both v7x TCs;
    # "parallel" is kept on single-core chips (v5e/v6e).
    try:
        kind = jax.devices()[0].device_kind.lower()
    except Exception:
        kind = ""
    if (("v7" in kind) or ("7x" in kind)) and B % 2 == 0:
        return (pltpu.CORE_PARALLEL,)
    return ("parallel",)


def adapt_conv2d_forward(x, p):
    B, C, H, W = x.shape
    HW = H * W
    C_pad = ((C + 7) // 8) * 8        # f32 sublane granule -> full-tile tap stores

    x2d = x.reshape(B, C, HW)         # metadata-only reshape
    if C_pad != C:
        x2d = jnp.pad(x2d, ((0, 0), (0, C_pad - C), (0, 0)))
    masks, sel = _precompute_masks(H, W)
    (w_stack, cg_b, lg_w_t, lg_b, lstm_w, lstm_b, lg_fc_w, lg_fc_b,
     cg_fc_w_t, cg_fc_b) = _prepare_operands(p, C, C_pad)

    kern = functools.partial(_adapt_conv2d_kernel, H=H, W=W, C_pad=C_pad)
    rep2 = lambda b: (0, 0)           # replicated (constant-index) blocks
    rep3 = lambda b: (0, 0, 0)

    out2d, layer_out, chan_out = pl.pallas_call(
        kern,
        out_shape=(jax.ShapeDtypeStruct((B, C_pad, HW), x.dtype),
                   jax.ShapeDtypeStruct((B, 1, 1), jnp.float32),
                   jax.ShapeDtypeStruct((B, 1, C_pad), jnp.float32)),
        grid_spec=pltpu.PrefetchScalarGridSpec(
            num_scalar_prefetch=0,
            grid=(B,),
            in_specs=[
                pl.BlockSpec((1, C_pad, HW), lambda b: (b, 0, 0)),   # x
                pl.BlockSpec((2 * C_pad, 9 * C_pad), rep2),          # stacked conv weights
                pl.BlockSpec((9, 1, HW), rep3),                      # 3x3 border masks
                pl.BlockSpec((1, HW), rep2),                         # stride-2 sel mask (scaled)
                pl.BlockSpec((C_pad, 1), rep2),                      # ChannelGate conv bias
                pl.BlockSpec((C_pad, _LSTM_HIDDEN), rep2),           # LayerGate 1x1 W^T
                pl.BlockSpec((1, _LSTM_HIDDEN), rep2),               # LayerGate 1x1 bias
                pl.BlockSpec((4 * _HG, _LSTM_HIDDEN), rep2),         # LSTM W_ih (regrouped)
                pl.BlockSpec((4 * _HG, 1), rep2),                    # LSTM b_ih + b_hh
                pl.BlockSpec((_HG, 1), rep2),                        # LayerGate FC W^T
                pl.BlockSpec((1, 1), rep2),                          # LayerGate FC bias
                pl.BlockSpec((C_pad, C_pad), rep2),                  # ChannelGate FC W^T
                pl.BlockSpec((1, C_pad), rep2),                      # ChannelGate FC bias
            ],
            out_specs=[
                pl.BlockSpec((1, C_pad, HW), lambda b: (b, 0, 0)),
                pl.BlockSpec((1, 1, 1), lambda b: (b, 0, 0)),
                pl.BlockSpec((1, 1, C_pad), lambda b: (b, 0, 0)),
            ],
            scratch_shapes=[pltpu.VMEM((9 * C_pad, HW), jnp.float32)]),
        compiler_params=pltpu.CompilerParams(
            dimension_semantics=_batch_dim_semantics(B)),
    )(x2d, w_stack, masks, sel, cg_b, lg_w_t, lg_b, lstm_w, lstm_b,
      lg_fc_w, lg_fc_b, cg_fc_w_t, cg_fc_b)

    out = out2d[:, :C, :].reshape(B, C, H, W)
    return out, layer_out[:, 0, :], chan_out[:, 0, :C]


# ----------------------------------------------------------------------------
# Deterministic parameter init matching the PyTorch module's layers
# ----------------------------------------------------------------------------
def init_params(key, C):
    ks = jax.random.split(key, 13)
    n = lambda k, s, sc=0.2: (sc * jax.random.normal(k, s)).astype(jnp.float32)
    return {
        'cg_conv_w': n(ks[0], (C, C, 3, 3)),       # ChannelGate conv (stride 2)
        'cg_conv_b': n(ks[1], (C,), 0.1),
        'cg_fc_w':   n(ks[2], (C, C)),
        'cg_fc_b':   n(ks[3], (C,), 0.1),
        'lg_conv_w': n(ks[4], (10, C)),            # LayerGate 1x1 conv, flattened
        'lg_conv_b': n(ks[5], (10,), 0.1),
        'lstm_w_ih': n(ks[6], (40, 10)),
        'lstm_w_hh': n(ks[7], (40, 10)),           # unused: h0 = 0
        'lstm_b_ih': n(ks[8], (40,), 0.1),
        'lstm_b_hh': n(ks[9], (40,), 0.1),
        'lg_fc_w':   n(ks[10], (1, 10)),
        'lg_fc_b':   n(ks[11], (1,), 0.1),
        'conv_w':    n(ks[12], (C, C, 3, 3)),      # main conv, bias=False
    }


if __name__ == "__main__":
    key = jax.random.PRNGKey(0)
    kx, kp = jax.random.split(key)
    B, C, H, W = 2, 4, 16, 16
    x = jax.random.normal(kx, (B, C, H, W), jnp.float32)
    params = init_params(kp, C)

    fwd = jax.jit(adapt_conv2d_forward)
    out, layer_idx, channel_idx = fwd(x, params)
    out = jax.block_until_ready(out)

    # --- pure-JAX reference (f32-precision matmuls/convs) -------------------
    with jax.default_matmul_precision("highest"):
        dn = ('NCHW', 'OIHW', 'NCHW')
        gap_ref = jnp.mean(x, axis=(2, 3))
        y = jnp.maximum(gap_ref @ params['lg_conv_w'].T + params['lg_conv_b'], 0.0)
        g = y @ params['lstm_w_ih'].T + params['lstm_b_ih'] + params['lstm_b_hh']
        i_, f_, g_, o_ = jnp.split(g, 4, axis=1)
        c = jax.nn.sigmoid(i_) * jnp.tanh(g_)
        h = jax.nn.sigmoid(o_) * jnp.tanh(c)
        z_l = h @ params['lg_fc_w'].T + params['lg_fc_b']            # (B, 1)
        layer_ref = (z_l > 0).astype(jnp.float32)

        cg = lax.conv_general_dilated(x, params['cg_conv_w'], (2, 2), 'VALID',
                                      dimension_numbers=dn)
        cg = jnp.maximum(cg + params['cg_conv_b'][None, :, None, None], 0.0)
        cgf_ref = jnp.mean(cg, axis=(2, 3))
        z_c = cgf_ref @ params['cg_fc_w'].T + params['cg_fc_b']      # (B, C)
        chan_ref = (z_c > 0).astype(jnp.float32)

        conv_all = lax.conv_general_dilated(x, params['conv_w'], (1, 1), 'SAME',
                                            dimension_numbers=dn)

    # Gate bits must agree with the reference except where the thresholded
    # pre-activation is genuinely borderline (|z| tiny).
    assert bool(jnp.all((layer_idx == layer_ref) | (jnp.abs(z_l) < 5e-3)))
    assert bool(jnp.all((channel_idx == chan_ref) | (jnp.abs(z_c) < 5e-3)))

    # Blend check uses the kernel's own gates (robust to borderline bits).
    eff = (layer_idx * channel_idx)[:, :, None, None]
    out_ref = eff * conv_all + (1.0 - eff) * x
    assert jnp.allclose(out, out_ref, rtol=2e-2, atol=2e-2)

    print("KERNEL_OK")
</pallas_src>

<mosaic_0001>
module attributes {stable_mosaic.version = 11 : i64} {
  func.func @_adapt_conv2d_kernel(%arg0: i32, %arg1: memref<1x8x256xf32, #tpu.memory_space<vmem>>, %arg2: memref<16x72xf32, #tpu.memory_space<vmem>>, %arg3: memref<9x1x256xf32, #tpu.memory_space<vmem>>, %arg4: memref<1x256xf32, #tpu.memory_space<vmem>>, %arg5: memref<8x1xf32, #tpu.memory_space<vmem>>, %arg6: memref<8x10xf32, #tpu.memory_space<vmem>>, %arg7: memref<1x10xf32, #tpu.memory_space<vmem>>, %arg8: memref<64x10xf32, #tpu.memory_space<vmem>>, %arg9: memref<64x1xf32, #tpu.memory_space<vmem>>, %arg10: memref<16x1xf32, #tpu.memory_space<vmem>>, %arg11: memref<1x1xf32, #tpu.memory_space<vmem>>, %arg12: memref<8x8xf32, #tpu.memory_space<vmem>>, %arg13: memref<1x8xf32, #tpu.memory_space<vmem>>, %arg14: memref<1x8x256xf32, #tpu.memory_space<vmem>>, %arg15: memref<1x1x1xf32, #tpu.memory_space<vmem>>, %arg16: memref<1x1x8xf32, #tpu.memory_space<vmem>>, %arg17: memref<72x256xf32, #tpu.memory_space<vmem>>) attributes {dimension_semantics = [#tpu.dimension_semantics<parallel>], iteration_bounds = array<i64: 2>, scalar_prefetch = 0 : i64, scratch_operands = 1 : i64, tpu.core_type = #tpu.core_type<tc>, window_params = [{transform_indices = @transform_0, window_bounds = array<i64: 1, 8, 256>}, {pipeline_mode = #tpu.pipeline_mode<synchronous>, transform_indices = @transform_1, window_bounds = array<i64: 16, 72>}, {pipeline_mode = #tpu.pipeline_mode<synchronous>, transform_indices = @transform_2, window_bounds = array<i64: 9, 1, 256>}, {pipeline_mode = #tpu.pipeline_mode<synchronous>, transform_indices = @transform_3, window_bounds = array<i64: 1, 256>}, {pipeline_mode = #tpu.pipeline_mode<synchronous>, transform_indices = @transform_4, window_bounds = array<i64: 8, 1>}, {pipeline_mode = #tpu.pipeline_mode<synchronous>, transform_indices = @transform_5, window_bounds = array<i64: 8, 10>}, {pipeline_mode = #tpu.pipeline_mode<synchronous>, transform_indices = @transform_6, window_bounds = array<i64: 1, 10>}, {pipeline_mode = #tpu.pipeline_mode<synchronous>, transform_indices = @transform_7, window_bounds = array<i64: 64, 10>}, {pipeline_mode = #tpu.pipeline_mode<synchronous>, transform_indices = @transform_8, window_bounds = array<i64: 64, 1>}, {pipeline_mode = #tpu.pipeline_mode<synchronous>, transform_indices = @transform_9, window_bounds = array<i64: 16, 1>}, {pipeline_mode = #tpu.pipeline_mode<synchronous>, transform_indices = @transform_10, window_bounds = array<i64: 1, 1>}, {pipeline_mode = #tpu.pipeline_mode<synchronous>, transform_indices = @transform_11, window_bounds = array<i64: 8, 8>}, {pipeline_mode = #tpu.pipeline_mode<synchronous>, transform_indices = @transform_12, window_bounds = array<i64: 1, 8>}, {transform_indices = @transform_13, window_bounds = array<i64: 1, 8, 256>}, {transform_indices = @transform_14, window_bounds = array<i64: 1, 1, 1>}, {transform_indices = @transform_15, window_bounds = array<i64: 1, 1, 8>}]} {
    %c0 = arith.constant 0 : index
    %c0_0 = arith.constant 0 : index
    %c0_1 = arith.constant 0 : index
    %0 = vector.load %arg1[%c0, %c0_0, %c0_1] : memref<1x8x256xf32, #tpu.memory_space<vmem>>, vector<1x8x256xf32>
    %1 = vector.shape_cast %0 : vector<1x8x256xf32> to vector<8x256xf32>
    %c17_i32 = arith.constant 17 : i32
    %2 = tpu.dynamic_rotate %1 by %c17_i32 dim 1 : vector<8x256xf32>, i32 -> vector<8x256xf32>
    %c0_2 = arith.constant 0 : index
    %c0_3 = arith.constant 0 : index
    %c0_4 = arith.constant 0 : index
    %3 = vector.load %arg3[%c0_2, %c0_3, %c0_4] : memref<9x1x256xf32, #tpu.memory_space<vmem>>, vector<1x1x256xf32>
    %4 = vector.shape_cast %3 : vector<1x1x256xf32> to vector<1x256xf32>
    %5 = vector.broadcast %4 : vector<1x256xf32> to vector<8x256xf32>
    %6 = arith.mulf %2, %5 : vector<8x256xf32>
    %c0_5 = arith.constant 0 : index
    %c0_6 = arith.constant 0 : index
    %7 = vector.load %arg17[%c0_5, %c0_6] : memref<72x256xf32, #tpu.memory_space<vmem>>, vector<8x256xf32>
    tpu.vector_store %arg17[%c0_5, %c0_6], %6 {strides = array<i32>} : memref<72x256xf32, #tpu.memory_space<vmem>>, vector<8x256xf32>,
    %c16_i32 = arith.constant 16 : i32
    %8 = tpu.dynamic_rotate %1 by %c16_i32 dim 1 : vector<8x256xf32>, i32 -> vector<8x256xf32>
    %c1 = arith.constant 1 : index
    %c0_7 = arith.constant 0 : index
    %c0_8 = arith.constant 0 : index
    %9 = vector.load %arg3[%c1, %c0_7, %c0_8] : memref<9x1x256xf32, #tpu.memory_space<vmem>>, vector<1x1x256xf32>
    %10 = vector.shape_cast %9 : vector<1x1x256xf32> to vector<1x256xf32>
    %11 = vector.broadcast %10 : vector<1x256xf32> to vector<8x256xf32>
    %12 = arith.mulf %8, %11 : vector<8x256xf32>
    %c8 = arith.constant 8 : index
    %c0_9 = arith.constant 0 : index
    %13 = vector.load %arg17[%c8, %c0_9] : memref<72x256xf32, #tpu.memory_space<vmem>>, vector<8x256xf32>
    tpu.vector_store %arg17[%c8, %c0_9], %12 {strides = array<i32>} : memref<72x256xf32, #tpu.memory_space<vmem>>, vector<8x256xf32>,
    %c15_i32 = arith.constant 15 : i32
    %14 = tpu.dynamic_rotate %1 by %c15_i32 dim 1 : vector<8x256xf32>, i32 -> vector<8x256xf32>
    %c2 = arith.constant 2 : index
    %c0_10 = arith.constant 0 : index
    %c0_11 = arith.constant 0 : index
    %15 = vector.load %arg3[%c2, %c0_10, %c0_11] : memref<9x1x256xf32, #tpu.memory_space<vmem>>, vector<1x1x256xf32>
    %16 = vector.shape_cast %15 : vector<1x1x256xf32> to vector<1x256xf32>
    %17 = vector.broadcast %16 : vector<1x256xf32> to vector<8x256xf32>
    %18 = arith.mulf %14, %17 : vector<8x256xf32>
    %c16 = arith.constant 16 : index
    %c0_12 = arith.constant 0 : index
    %19 = vector.load %arg17[%c16, %c0_12] : memref<72x256xf32, #tpu.memory_space<vmem>>, vector<8x256xf32>
    tpu.vector_store %arg17[%c16, %c0_12], %18 {strides = array<i32>} : memref<72x256xf32, #tpu.memory_space<vmem>>, vector<8x256xf32>,
    %c1_i32 = arith.constant 1 : i32
    %20 = tpu.dynamic_rotate %1 by %c1_i32 dim 1 : vector<8x256xf32>, i32 -> vector<8x256xf32>
    %c3 = arith.constant 3 : index
    %c0_13 = arith.constant 0 : index
    %c0_14 = arith.constant 0 : index
    %21 = vector.load %arg3[%c3, %c0_13, %c0_14] : memref<9x1x256xf32, #tpu.memory_space<vmem>>, vector<1x1x256xf32>
    %22 = vector.shape_cast %21 : vector<1x1x256xf32> to vector<1x256xf32>
    %23 = vector.broadcast %22 : vector<1x256xf32> to vector<8x256xf32>
    %24 = arith.mulf %20, %23 : vector<8x256xf32>
    %c24 = arith.constant 24 : index
    %c0_15 = arith.constant 0 : index
    %25 = vector.load %arg17[%c24, %c0_15] : memref<72x256xf32, #tpu.memory_space<vmem>>, vector<8x256xf32>
    tpu.vector_store %arg17[%c24, %c0_15], %24 {strides = array<i32>} : memref<72x256xf32, #tpu.memory_space<vmem>>, vector<8x256xf32>,
    %c4 = arith.constant 4 : index
    %c0_16 = arith.constant 0 : index
    %c0_17 = arith.constant 0 : index
    %26 = vector.load %arg3[%c4, %c0_16, %c0_17] : memref<9x1x256xf32, #tpu.memory_space<vmem>>, vector<1x1x256xf32>
    %27 = vector.shape_cast %26 : vector<1x1x256xf32> to vector<1x256xf32>
    %28 = vector.broadcast %27 : vector<1x256xf32> to vector<8x256xf32>
    %29 = arith.mulf %1, %28 : vector<8x256xf32>
    %c32 = arith.constant 32 : index
    %c0_18 = arith.constant 0 : index
    %30 = vector.load %arg17[%c32, %c0_18] : memref<72x256xf32, #tpu.memory_space<vmem>>, vector<8x256xf32>
    tpu.vector_store %arg17[%c32, %c0_18], %29 {strides = array<i32>} : memref<72x256xf32, #tpu.memory_space<vmem>>, vector<8x256xf32>,
    %c255_i32 = arith.constant 255 : i32
    %31 = tpu.dynamic_rotate %1 by %c255_i32 dim 1 : vector<8x256xf32>, i32 -> vector<8x256xf32>
    %c5 = arith.constant 5 : index
    %c0_19 = arith.constant 0 : index
    %c0_20 = arith.constant 0 : index
    %32 = vector.load %arg3[%c5, %c0_19, %c0_20] : memref<9x1x256xf32, #tpu.memory_space<vmem>>, vector<1x1x256xf32>
    %33 = vector.shape_cast %32 : vector<1x1x256xf32> to vector<1x256xf32>
    %34 = vector.broadcast %33 : vector<1x256xf32> to vector<8x256xf32>
    %35 = arith.mulf %31, %34 : vector<8x256xf32>
    %c40 = arith.constant 40 : index
    %c0_21 = arith.constant 0 : index
    %36 = vector.load %arg17[%c40, %c0_21] : memref<72x256xf32, #tpu.memory_space<vmem>>, vector<8x256xf32>
    tpu.vector_store %arg17[%c40, %c0_21], %35 {strides = array<i32>} : memref<72x256xf32, #tpu.memory_space<vmem>>, vector<8x256xf32>,
    %c241_i32 = arith.constant 241 : i32
    %37 = tpu.dynamic_rotate %1 by %c241_i32 dim 1 : vector<8x256xf32>, i32 -> vector<8x256xf32>
    %c6 = arith.constant 6 : index
    %c0_22 = arith.constant 0 : index
    %c0_23 = arith.constant 0 : index
    %38 = vector.load %arg3[%c6, %c0_22, %c0_23] : memref<9x1x256xf32, #tpu.memory_space<vmem>>, vector<1x1x256xf32>
    %39 = vector.shape_cast %38 : vector<1x1x256xf32> to vector<1x256xf32>
    %40 = vector.broadcast %39 : vector<1x256xf32> to vector<8x256xf32>
    %41 = arith.mulf %37, %40 : vector<8x256xf32>
    %c48 = arith.constant 48 : index
    %c0_24 = arith.constant 0 : index
    %42 = vector.load %arg17[%c48, %c0_24] : memref<72x256xf32, #tpu.memory_space<vmem>>, vector<8x256xf32>
    tpu.vector_store %arg17[%c48, %c0_24], %41 {strides = array<i32>} : memref<72x256xf32, #tpu.memory_space<vmem>>, vector<8x256xf32>,
    %c240_i32 = arith.constant 240 : i32
    %43 = tpu.dynamic_rotate %1 by %c240_i32 dim 1 : vector<8x256xf32>, i32 -> vector<8x256xf32>
    %c7 = arith.constant 7 : index
    %c0_25 = arith.constant 0 : index
    %c0_26 = arith.constant 0 : index
    %44 = vector.load %arg3[%c7, %c0_25, %c0_26] : memref<9x1x256xf32, #tpu.memory_space<vmem>>, vector<1x1x256xf32>
    %45 = vector.shape_cast %44 : vector<1x1x256xf32> to vector<1x256xf32>
    %46 = vector.broadcast %45 : vector<1x256xf32> to vector<8x256xf32>
    %47 = arith.mulf %43, %46 : vector<8x256xf32>
    %c56 = arith.constant 56 : index
    %c0_27 = arith.constant 0 : index
    %48 = vector.load %arg17[%c56, %c0_27] : memref<72x256xf32, #tpu.memory_space<vmem>>, vector<8x256xf32>
    tpu.vector_store %arg17[%c56, %c0_27], %47 {strides = array<i32>} : memref<72x256xf32, #tpu.memory_space<vmem>>, vector<8x256xf32>,
    %c239_i32 = arith.constant 239 : i32
    %49 = tpu.dynamic_rotate %1 by %c239_i32 dim 1 : vector<8x256xf32>, i32 -> vector<8x256xf32>
    %c8_28 = arith.constant 8 : index
    %c0_29 = arith.constant 0 : index
    %c0_30 = arith.constant 0 : index
    %50 = vector.load %arg3[%c8_28, %c0_29, %c0_30] : memref<9x1x256xf32, #tpu.memory_space<vmem>>, vector<1x1x256xf32>
    %51 = vector.shape_cast %50 : vector<1x1x256xf32> to vector<1x256xf32>
    %52 = vector.broadcast %51 : vector<1x256xf32> to vector<8x256xf32>
    %53 = arith.mulf %49, %52 : vector<8x256xf32>
    %c64 = arith.constant 64 : index
    %c0_31 = arith.constant 0 : index
    %54 = vector.load %arg17[%c64, %c0_31] : memref<72x256xf32, #tpu.memory_space<vmem>>, vector<8x256xf32>
    tpu.vector_store %arg17[%c64, %c0_31], %53 {strides = array<i32>} : memref<72x256xf32, #tpu.memory_space<vmem>>, vector<8x256xf32>,
    %c0_32 = arith.constant 0 : index
    %c0_33 = arith.constant 0 : index
    %55 = vector.load %arg2[%c0_32, %c0_33] : memref<16x72xf32, #tpu.memory_space<vmem>>, vector<16x72xf32>
    %c0_34 = arith.constant 0 : index
    %c0_35 = arith.constant 0 : index
    %56 = vector.load %arg17[%c0_34, %c0_35] : memref<72x256xf32, #tpu.memory_space<vmem>>, vector<72x256xf32>
    %cst = arith.constant dense<0.000000e+00> : vector<16x256xf32>
    %57 = tpu.matmul %55, %56, %cst {dimension_numbers = #tpu.dot_dimension_numbers<[1], [0], [0], [1], [0, 0, 1, 1], [], []>} : vector<16x72xf32>, vector<72x256xf32>, vector<16x256xf32> -> vector<16x256xf32>
    %58 = vector.extract_strided_slice %57 {offsets = [0, 0], sizes = [8, 256], strides = [1, 1]} : vector<16x256xf32> to vector<8x256xf32>
    %c0_36 = arith.constant 0 : index
    %c0_37 = arith.constant 0 : index
    %59 = vector.load %arg5[%c0_36, %c0_37] : memref<8x1xf32, #tpu.memory_space<vmem>>, vector<8x1xf32>
    %60 = vector.broadcast %59 : vector<8x1xf32> to vector<8x256xf32>
    %61 = arith.addf %58, %60 : vector<8x256xf32>
    %cst_38 = arith.constant 0.000000e+00 : f32
    %62 = vector.broadcast %cst_38 : f32 to vector<8x256xf32>
    %63 = arith.maximumf %61, %62 : vector<8x256xf32>
    %64 = vector.extract_strided_slice %57 {offsets = [8, 0], sizes = [8, 256], strides = [1, 1]} : vector<16x256xf32> to vector<8x256xf32>
    %cst_39 = arith.constant dense<0.000000e+00> : vector<8xf32>
    %65 = vector.multi_reduction <add>, %1, %cst_39 [1] : vector<8x256xf32> to vector<8xf32>
    %66 = vector.shape_cast %65 : vector<8xf32> to vector<8x1xf32>
    %cst_40 = arith.constant 2.560000e+02 : f32
    %67 = vector.broadcast %cst_40 : f32 to vector<8x1xf32>
    %68 = arith.divf %66, %67 : vector<8x1xf32>
    %c0_41 = arith.constant 0 : index
    %c0_42 = arith.constant 0 : index
    %69 = vector.load %arg6[%c0_41, %c0_42] : memref<8x10xf32, #tpu.memory_space<vmem>>, vector<8x10xf32>
    %70 = vector.broadcast %68 : vector<8x1xf32> to vector<8x10xf32>
    %71 = arith.mulf %69, %70 : vector<8x10xf32>
    %cst_43 = arith.constant dense<0.000000e+00> : vector<10xf32>
    %72 = vector.multi_reduction <add>, %71, %cst_43 [0] : vector<8x10xf32> to vector<10xf32>
    %73 = vector.shape_cast %72 : vector<10xf32> to vector<1x10xf32>
    %c0_44 = arith.constant 0 : index
    %c0_45 = arith.constant 0 : index
    %74 = vector.load %arg7[%c0_44, %c0_45] : memref<1x10xf32, #tpu.memory_space<vmem>>, vector<1x10xf32>
    %75 = arith.addf %73, %74 : vector<1x10xf32>
    %cst_46 = arith.constant 0.000000e+00 : f32
    %76 = vector.broadcast %cst_46 : f32 to vector<1x10xf32>
    %77 = arith.maximumf %75, %76 : vector<1x10xf32>
    %c0_47 = arith.constant 0 : index
    %c0_48 = arith.constant 0 : index
    %78 = vector.load %arg8[%c0_47, %c0_48] : memref<64x10xf32, #tpu.memory_space<vmem>>, vector<64x10xf32>
    %79 = vector.broadcast %77 : vector<1x10xf32> to vector<64x10xf32>
    %80 = arith.mulf %78, %79 : vector<64x10xf32>
    %cst_49 = arith.constant dense<0.000000e+00> : vector<64xf32>
    %81 = vector.multi_reduction <add>, %80, %cst_49 [1] : vector<64x10xf32> to vector<64xf32>
    %82 = vector.shape_cast %81 : vector<64xf32> to vector<64x1xf32>
    %c0_50 = arith.constant 0 : index
    %c0_51 = arith.constant 0 : index
    %83 = vector.load %arg9[%c0_50, %c0_51] : memref<64x1xf32, #tpu.memory_space<vmem>>, vector<64x1xf32>
    %84 = arith.addf %82, %83 : vector<64x1xf32>
    %85 = vector.extract_strided_slice %84 {offsets = [0, 0], sizes = [16, 1], strides = [1, 1]} : vector<64x1xf32> to vector<16x1xf32>
    %cst_52 = arith.constant 0.000000e+00 : f32
    %86 = vector.broadcast %cst_52 : f32 to vector<16x1xf32>
    %87 = arith.subf %86, %85 : vector<16x1xf32>
    %88 = math.exp %87 : vector<16x1xf32>
    %cst_53 = arith.constant 1.000000e+00 : f32
    %89 = vector.broadcast %cst_53 : f32 to vector<16x1xf32>
    %90 = arith.addf %89, %88 : vector<16x1xf32>
    %cst_54 = arith.constant 1.000000e+00 : f32
    %91 = vector.broadcast %cst_54 : f32 to vector<16x1xf32>
    %92 = arith.divf %91, %90 : vector<16x1xf32>
    %93 = vector.extract_strided_slice %84 {offsets = [32, 0], sizes = [16, 1], strides = [1, 1]} : vector<64x1xf32> to vector<16x1xf32>
    %cst_55 = arith.constant -2.000000e+00 : f32
    %94 = vector.broadcast %cst_55 : f32 to vector<16x1xf32>
    %95 = arith.mulf %94, %93 : vector<16x1xf32>
    %96 = math.exp %95 : vector<16x1xf32>
    %cst_56 = arith.constant 1.000000e+00 : f32
    %97 = vector.broadcast %cst_56 : f32 to vector<16x1xf32>
    %98 = arith.addf %97, %96 : vector<16x1xf32>
    %cst_57 = arith.constant 2.000000e+00 : f32
    %99 = vector.broadcast %cst_57 : f32 to vector<16x1xf32>
    %100 = arith.divf %99, %98 : vector<16x1xf32>
    %cst_58 = arith.constant 1.000000e+00 : f32
    %101 = vector.broadcast %cst_58 : f32 to vector<16x1xf32>
    %102 = arith.subf %100, %101 : vector<16x1xf32>
    %103 = vector.extract_strided_slice %84 {offsets = [48, 0], sizes = [16, 1], strides = [1, 1]} : vector<64x1xf32> to vector<16x1xf32>
    %cst_59 = arith.constant 0.000000e+00 : f32
    %104 = vector.broadcast %cst_59 : f32 to vector<16x1xf32>
    %105 = arith.subf %104, %103 : vector<16x1xf32>
    %106 = math.exp %105 : vector<16x1xf32>
    %cst_60 = arith.constant 1.000000e+00 : f32
    %107 = vector.broadcast %cst_60 : f32 to vector<16x1xf32>
    %108 = arith.addf %107, %106 : vector<16x1xf32>
    %cst_61 = arith.constant 1.000000e+00 : f32
    %109 = vector.broadcast %cst_61 : f32 to vector<16x1xf32>
    %110 = arith.divf %109, %108 : vector<16x1xf32>
    %111 = arith.mulf %92, %102 : vector<16x1xf32>
    %cst_62 = arith.constant -2.000000e+00 : f32
    %112 = vector.broadcast %cst_62 : f32 to vector<16x1xf32>
    %113 = arith.mulf %112, %111 : vector<16x1xf32>
    %114 = math.exp %113 : vector<16x1xf32>
    %cst_63 = arith.constant 1.000000e+00 : f32
    %115 = vector.broadcast %cst_63 : f32 to vector<16x1xf32>
    %116 = arith.addf %115, %114 : vector<16x1xf32>
    %cst_64 = arith.constant 2.000000e+00 : f32
    %117 = vector.broadcast %cst_64 : f32 to vector<16x1xf32>
    %118 = arith.divf %117, %116 : vector<16x1xf32>
    %cst_65 = arith.constant 1.000000e+00 : f32
    %119 = vector.broadcast %cst_65 : f32 to vector<16x1xf32>
    %120 = arith.subf %118, %119 : vector<16x1xf32>
    %121 = arith.mulf %110, %120 : vector<16x1xf32>
    %c0_66 = arith.constant 0 : index
    %c0_67 = arith.constant 0 : index
    %122 = vector.load %arg10[%c0_66, %c0_67] : memref<16x1xf32, #tpu.memory_space<vmem>>, vector<16x1xf32>
    %123 = arith.mulf %122, %121 : vector<16x1xf32>
    %cst_68 = arith.constant dense<0.000000e+00> : vector<1xf32>
    %124 = vector.multi_reduction <add>, %123, %cst_68 [0] : vector<16x1xf32> to vector<1xf32>
    %125 = vector.shape_cast %124 : vector<1xf32> to vector<1x1xf32>
    %c0_69 = arith.constant 0 : index
    %c0_70 = arith.constant 0 : index
    %126 = vector.load %arg11[%c0_69, %c0_70] : memref<1x1xf32, #tpu.memory_space<vmem>>, vector<1x1xf32>
    %127 = arith.addf %125, %126 : vector<1x1xf32>
    %cst_71 = arith.constant 0.000000e+00 : f32
    %128 = vector.broadcast %cst_71 : f32 to vector<1x1xf32>
    %129 = arith.cmpf ogt, %127, %128 : vector<1x1xf32>
    %130 = arith.extui %129 : vector<1x1xi1> to vector<1x1xi32>
    %131 = arith.sitofp %130 : vector<1x1xi32> to vector<1x1xf32>
    %c0_72 = arith.constant 0 : index
    %c0_73 = arith.constant 0 : index
    %132 = vector.load %arg4[%c0_72, %c0_73] : memref<1x256xf32, #tpu.memory_space<vmem>>, vector<1x256xf32>
    %133 = vector.broadcast %132 : vector<1x256xf32> to vector<8x256xf32>
    %134 = arith.mulf %63, %133 : vector<8x256xf32>
    %cst_74 = arith.constant dense<0.000000e+00> : vector<8xf32>
    %135 = vector.multi_reduction <add>, %134, %cst_74 [1] : vector<8x256xf32> to vector<8xf32>
    %136 = vector.shape_cast %135 : vector<8xf32> to vector<8x1xf32>
    %c0_75 = arith.constant 0 : index
    %c0_76 = arith.constant 0 : index
    %137 = vector.load %arg12[%c0_75, %c0_76] : memref<8x8xf32, #tpu.memory_space<vmem>>, vector<8x8xf32>
    %138 = vector.broadcast %136 : vector<8x1xf32> to vector<8x8xf32>
    %139 = arith.mulf %137, %138 : vector<8x8xf32>
    %cst_77 = arith.constant dense<0.000000e+00> : vector<8xf32>
    %140 = vector.multi_reduction <add>, %139, %cst_77 [0] : vector<8x8xf32> to vector<8xf32>
    %141 = vector.shape_cast %140 : vector<8xf32> to vector<1x8xf32>
    %c0_78 = arith.constant 0 : index
    %c0_79 = arith.constant 0 : index
    %142 = vector.load %arg13[%c0_78, %c0_79] : memref<1x8xf32, #tpu.memory_space<vmem>>, vector<1x8xf32>
    %143 = arith.addf %141, %142 : vector<1x8xf32>
    %cst_80 = arith.constant 0.000000e+00 : f32
    %144 = vector.broadcast %cst_80 : f32 to vector<1x8xf32>
    %145 = arith.cmpf ogt, %143, %144 : vector<1x8xf32>
    %146 = arith.extui %145 : vector<1x8xi1> to vector<1x8xi32>
    %147 = arith.sitofp %146 : vector<1x8xi32> to vector<1x8xf32>
    %148 = tpu.iota {dimensions = array<i32: 0>} : vector<8x8xi32>
    %149 = tpu.iota {dimensions = array<i32: 1>} : vector<8x8xi32>
    %150 = arith.cmpi eq, %148, %149 : vector<8x8xi32>
    %151 = arith.extui %150 : vector<8x8xi1> to vector<8x8xi32>
    %152 = arith.sitofp %151 : vector<8x8xi32> to vector<8x8xf32>
    %153 = vector.broadcast %147 : vector<1x8xf32> to vector<8x8xf32>
    %154 = arith.mulf %152, %153 : vector<8x8xf32>
    %cst_81 = arith.constant dense<0.000000e+00> : vector<8xf32>
    %155 = vector.multi_reduction <add>, %154, %cst_81 [1] : vector<8x8xf32> to vector<8xf32>
    %156 = vector.shape_cast %155 : vector<8xf32> to vector<8x1xf32>
    %157 = vector.broadcast %131 : vector<1x1xf32> to vector<8x1xf32>
    %158 = arith.mulf %156, %157 : vector<8x1xf32>
    %159 = vector.broadcast %158 : vector<8x1xf32> to vector<8x256xf32>
    %160 = arith.mulf %159, %64 : vector<8x256xf32>
    %cst_82 = arith.constant 1.000000e+00 : f32
    %161 = vector.broadcast %cst_82 : f32 to vector<8x1xf32>
    %162 = arith.subf %161, %158 : vector<8x1xf32>
    %163 = vector.broadcast %162 : vector<8x1xf32> to vector<8x256xf32>
    %164 = arith.mulf %163, %1 : vector<8x256xf32>
    %165 = arith.addf %160, %164 : vector<8x256xf32>
    %c0_83 = arith.constant 0 : index
    %c0_84 = arith.constant 0 : index
    %c0_85 = arith.constant 0 : index
    %166 = vector.load %arg14[%c0_83, %c0_84, %c0_85] : memref<1x8x256xf32, #tpu.memory_space<vmem>>, vector<1x8x256xf32>
    %167 = vector.shape_cast %166 : vector<1x8x256xf32> to vector<8x256xf32>
    %168 = vector.shape_cast %165 : vector<8x256xf32> to vector<1x8x256xf32>
    tpu.vector_store %arg14[%c0_83, %c0_84, %c0_85], %168 {strides = array<i32>} : memref<1x8x256xf32, #tpu.memory_space<vmem>>, vector<1x8x256xf32>,
    %c0_86 = arith.constant 0 : index
    %c0_87 = arith.constant 0 : index
    %c0_88 = arith.constant 0 : index
    %169 = vector.load %arg15[%c0_86, %c0_87, %c0_88] : memref<1x1x1xf32, #tpu.memory_space<vmem>>, vector<1x1x1xf32>
    %170 = vector.shape_cast %169 : vector<1x1x1xf32> to vector<1x1xf32>
    %171 = vector.shape_cast %131 : vector<1x1xf32> to vector<1x1x1xf32>
    tpu.vector_store %arg15[%c0_86, %c0_87, %c0_88], %171 {strides = array<i32>} : memref<1x1x1xf32, #tpu.memory_space<vmem>>, vector<1x1x1xf32>,
    %c0_89 = arith.constant 0 : index
    %c0_90 = arith.constant 0 : index
    %c0_91 = arith.constant 0 : index
    %172 = vector.load %arg16[%c0_89, %c0_90, %c0_91] : memref<1x1x8xf32, #tpu.memory_space<vmem>>, vector<1x1x8xf32>
    %173 = vector.shape_cast %172 : vector<1x1x8xf32> to vector<1x8xf32>
    %174 = vector.shape_cast %147 : vector<1x8xf32> to vector<1x1x8xf32>
    tpu.vector_store %arg16[%c0_89, %c0_90, %c0_91], %174 {strides = array<i32>} : memref<1x1x8xf32, #tpu.memory_space<vmem>>, vector<1x1x8xf32>,
    return
  }
  func.func @transform_0(%arg0: i32) -> (i32, i32, i32) {
    %c0_i32 = arith.constant 0 : i32
    %c0_i32_0 = arith.constant 0 : i32
    %c0_i32_1 = arith.constant 0 : i32
    return %arg0, %c0_i32, %c0_i32_0 : i32, i32, i32
  }
  func.func @transform_1(%arg0: i32) -> (i32, i32) {
    %c0_i32 = arith.constant 0 : i32
    %c0_i32_0 = arith.constant 0 : i32
    %c0_i32_1 = arith.constant 0 : i32
    return %c0_i32, %c0_i32_0 : i32, i32
  }
  func.func @transform_2(%arg0: i32) -> (i32, i32, i32) {
    %c0_i32 = arith.constant 0 : i32
    %c0_i32_0 = arith.constant 0 : i32
    %c0_i32_1 = arith.constant 0 : i32
    %c0_i32_2 = arith.constant 0 : i32
    return %c0_i32, %c0_i32_0, %c0_i32_1 : i32, i32, i32
  }
  func.func @transform_3(%arg0: i32) -> (i32, i32) {
    %c0_i32 = arith.constant 0 : i32
    %c0_i32_0 = arith.constant 0 : i32
    %c0_i32_1 = arith.constant 0 : i32
    return %c0_i32, %c0_i32_0 : i32, i32
  }
  func.func @transform_4(%arg0: i32) -> (i32, i32) {
    %c0_i32 = arith.constant 0 : i32
    %c0_i32_0 = arith.constant 0 : i32
    %c0_i32_1 = arith.constant 0 : i32
    return %c0_i32, %c0_i32_0 : i32, i32
  }
  func.func @transform_5(%arg0: i32) -> (i32, i32) {
    %c0_i32 = arith.constant 0 : i32
    %c0_i32_0 = arith.constant 0 : i32
    %c0_i32_1 = arith.constant 0 : i32
    return %c0_i32, %c0_i32_0 : i32, i32
  }
  func.func @transform_6(%arg0: i32) -> (i32, i32) {
    %c0_i32 = arith.constant 0 : i32
    %c0_i32_0 = arith.constant 0 : i32
    %c0_i32_1 = arith.constant 0 : i32
    return %c0_i32, %c0_i32_0 : i32, i32
  }
  func.func @transform_7(%arg0: i32) -> (i32, i32) {
    %c0_i32 = arith.constant 0 : i32
    %c0_i32_0 = arith.constant 0 : i32
    %c0_i32_1 = arith.constant 0 : i32
    return %c0_i32, %c0_i32_0 : i32, i32
  }
  func.func @transform_8(%arg0: i32) -> (i32, i32) {
    %c0_i32 = arith.constant 0 : i32
    %c0_i32_0 = arith.constant 0 : i32
    %c0_i32_1 = arith.constant 0 : i32
    return %c0_i32, %c0_i32_0 : i32, i32
  }
  func.func @transform_9(%arg0: i32) -> (i32, i32) {
    %c0_i32 = arith.constant 0 : i32
    %c0_i32_0 = arith.constant 0 : i32
    %c0_i32_1 = arith.constant 0 : i32
    return %c0_i32, %c0_i32_0 : i32, i32
  }
  func.func @transform_10(%arg0: i32) -> (i32, i32) {
    %c0_i32 = arith.constant 0 : i32
    %c0_i32_0 = arith.constant 0 : i32
    %c0_i32_1 = arith.constant 0 : i32
    return %c0_i32, %c0_i32_0 : i32, i32
  }
  func.func @transform_11(%arg0: i32) -> (i32, i32) {
    %c0_i32 = arith.constant 0 : i32
    %c0_i32_0 = arith.constant 0 : i32
    %c0_i32_1 = arith.constant 0 : i32
    return %c0_i32, %c0_i32_0 : i32, i32
  }
  func.func @transform_12(%arg0: i32) -> (i32, i32) {
    %c0_i32 = arith.constant 0 : i32
    %c0_i32_0 = arith.constant 0 : i32
    %c0_i32_1 = arith.constant 0 : i32
    return %c0_i32, %c0_i32_0 : i32, i32
  }
  func.func @transform_13(%arg0: i32) -> (i32, i32, i32) {
    %c0_i32 = arith.constant 0 : i32
    %c0_i32_0 = arith.constant 0 : i32
    %c0_i32_1 = arith.constant 0 : i32
    return %arg0, %c0_i32, %c0_i32_0 : i32, i32, i32
  }
  func.func @transform_14(%arg0: i32) -> (i32, i32, i32) {
    %c0_i32 = arith.constant 0 : i32
    %c0_i32_0 = arith.constant 0 : i32
    %c0_i32_1 = arith.constant 0 : i32
    return %arg0, %c0_i32, %c0_i32_0 : i32, i32, i32
  }
  func.func @transform_15(%arg0: i32) -> (i32, i32, i32) {
    %c0_i32 = arith.constant 0 : i32
    %c0_i32_0 = arith.constant 0 : i32
    %c0_i32_1 = arith.constant 0 : i32
    return %arg0, %c0_i32, %c0_i32_0 : i32, i32, i32
  }
}

</mosaic_0001>

<bundles_post_ra>
// kernel: adapt_conv2d_forward.1
= control target key start
LH: loop header
LB: loop body
LE: loop exit
PB: predicated region body
PF: predicated region fallthrough
CT: control target
= control target key end

     0   :  { %s1774_s0 = inlined_call_operand.vmem [shape: f32[2,8,256], index: 0, kind: input, shape index: {}]   ;;  %s1775_s1 = inlined_call_operand.vmem [shape: f32[16,72], index: 1, kind: input, shape index: {}]   ;;  %s1776_s2 = inlined_call_operand.vmem [shape: f32[9,1,256], index: 2, kind: input, shape index: {}]   ;;  %s1777_s3 = inlined_call_operand.vmem [shape: f32[1,256], index: 3, kind: input, shape index: {}]   ;;  %s1778_s4 = inlined_call_operand.vmem [shape: f32[8,1], index: 4, kind: input, shape index: {}]   ;;  %s1779_s5 = inlined_call_operand.vmem [shape: f32[8,10], index: 5, kind: input, shape index: {}]   ;;  %s1780_s6 = inlined_call_operand.vmem [shape: f32[1,10], index: 6, kind: input, shape index: {}]   ;;  %s1781_s7 = inlined_call_operand.vmem [shape: f32[64,10], index: 7, kind: input, shape index: {}]   ;;  %s1782_s8 = inlined_call_operand.vmem [shape: f32[64,1], index: 8, kind: input, shape index: {}]   ;;  %s1783_s9 = inlined_call_operand.vmem [shape: f32[16,1], index: 9, kind: input, shape index: {}]   ;;  %s1784_s10 = inlined_call_operand.<no memory space> [shape: f32[1,1], index: 10, kind: input, shape index: {}]   ;;  %s1785_s11 = inlined_call_operand.vmem [shape: f32[8,8], index: 11, kind: input, shape index: {}]   ;;  %s1786_s12 = inlined_call_operand.vmem [shape: f32[1,8], index: 12, kind: input, shape index: {}]   ;;  %s1787_s13 = inlined_call_operand.vmem [shape: f32[2,8,256], index: 13, kind: output, shape index: {0}]   ;;  %s1788_s14 = inlined_call_operand.vmem [shape: f32[2,1,1], index: 14, kind: output, shape index: {1}]   ;;  %s1789_s15 = inlined_call_operand.hbm [shape: f32[2,1,8], index: 15, kind: output, shape index: {2}]  }
   0x1   :  { %1791 = sst [smem:[#allocation8_spill]] %s1774_s0  ;;  %v21_v0 = vstv %s1784_s10 }
   0x2   :  { %1792 = sst [smem:[#allocation9_spill]] %s1775_s1  ;;  %22 = vst [vmem:[#allocation3] sm:$0x1] %v21_v0 }
   0x3   :  { %1793 = sst [smem:[#allocation10_spill]] %s1776_s2 }
   0x4   :  { %1794 = sst [smem:[#allocation11_spill]] %s1777_s3 }
   0x5   :  { %1795 = sst [smem:[#allocation12_spill]] %s1778_s4 }
   0x6   :  { %23 = vsyncpa [#allocation5], 0 }
   0x7   :  { %25 = vsyncpa [#allocation5 + $0x1], 0  ;;  %s1476_s20 = smov 0   ;;  %s1478_s21 = smov 0  }
   0x8   :  { %s1480_s22 = smov 0   ;;  %s1482_s23 = smov 0  }
   0x9 LB: > { %s1497_s10 = sadd.s32 4294967295, %s1380_s23   ;;  %s1179_s24 = sadd.s32 4294967294, %s1380_s23   ;;  %s1380_s23 = sphi %s1482_s23, %s1809_s23   ;;  %s1376_s22 = sphi %s1480_s22, %s1808_s22   ;;  %s1372_s21 = sphi %s1478_s21, %s1807_s21   ;;  %s1368_s20 = sphi %s1476_s20, %s1806_s20  }
   0xa   : > { %s1501_s25 = sadd.s32 1, %s1380_s23   ;;  %s368_s26 = sadd.s32 1, %s1376_s22 }
   0xb   : > { %s365_s27 = ssub.s32 %s1380_s23, %s1501_s25  ;;  %p378_p0 = scmp.ne.s32.totalorder %s1376_s22, %s1372_s21 }
   0xc   : > { %p366_p1 = scmp.eq.s32.totalorder %s365_s27, 0  ;;  %p379_p2 = scmp.eq.s32.totalorder %s1497_s10, 1 }
   0xd   : > { %p384_p3 = scmp.ne.s32.totalorder %s1372_s21, %s1368_s20  ;;  %p385_p4 = scmp.eq.s32.totalorder %s1179_s24, 1 }
   0xe   : > { %s1512_s28 = scalar_select %p366_p1, %s1376_s22, %s368_s26  }
   0xf   : > { %p1514_p5 = por %p379_p2, %p378_p0  ;;  %p1518_p6 = por %p385_p4, %p384_p3 }
  0x10   : > { %1796 = sst [smem:[#allocation7_spill]] %s1512_s28  ;;  %p1182_p7 = scmp.ge.s32.totalorder %s1380_s23, 1 }
  0x11   : > { %p447_p8 = scmp.lt.s32.totalorder %s1380_s23, 3 }
  0x13   : > { %p448_p9 = pnand %p1182_p7, %p447_p8 }
  0x14   : > { %p502_p10 = scmp.lt.s32.totalorder (!%p448_p9), %s1497_s10, 1  ;;  %s1799_s0 = sld [smem:[#allocation8_spill]] (!%p448_p9)  ;;  %v1388_v3 = vmov (!%p448_p9), 0.0   ;;  %v1389_v4 = vmov (!%p448_p9), 0   ;;  %v521_v7 = vlaneseq (!%p448_p9)  ;;  %vm747_vm8 = vcmask (!%p448_p9), 588800  }
  0x15   : > { %451 = sbr.rel (%p448_p9) target bundleno = 849 (0x351), region = 72  ;;  %s1382_s26 = smov (!%p448_p9), 16   ;;  %818 = vmatprep.mubr.f32.mxu0 (!%p448_p9), %v1388_v3  ;;  %824 = vmatprep.mubr.f32.mxu1 (!%p448_p9), %v1388_v3  ;;  %vm848_vm9 = vcmask (!%p448_p9), 80896   ;;  %vm999_vm10 = vcmask (!%p448_p9), 64512   ;;  %vm1051_vm12 = vcmask (!%p448_p9), 57344   ;;  %vm965_vm14 = vcmask (!%p448_p9), 7168  }
  0x16   : > { %s1383_s27 = smov (!%p448_p9), 17   ;;  %s1384_s28 = smov (!%p448_p9), 15   ;;  %1284 = vset.pattern.permute.xlu1 (!%p448_p9), %v1389_v4  ;;  %1285 = vset.pattern.permute.xlu0 (!%p448_p9), %v1389_v4  ;;  %v1561_v8 = vshrl.u32 (!%p448_p9), %v521_v7, 7  ;;  %v1563_v9 = vand.u32 (!%p448_p9), 127, %v521_v7  ;;  %vm1049_vm15 = vcmask (!%p448_p9), 0  }
  0x17   : > { %s1385_s18 = smov (!%p448_p9), 1   ;;  %s1386_s19 = smov (!%p448_p9), 127  }
  0x18   : > { %s1800_s4 = sld [smem:[#allocation12_spill]] (!%p448_p9)  ;;  %v1566_v10 = vsub.s32 (!%p448_p9), 0, %v1561_v8  ;;  %v1569_v11 = vsub.s32 (!%p448_p9), 1, %v1561_v8  ;;  %s1801_s2 = sld [smem:[#allocation10_spill]] (!%p448_p9)  ;;  %vm546_vm0 = vcmp.lt.s32.totalorder (!%p448_p9), %v1563_v9, 16  ;;  %vm523_vm1 = vcmp.lt.s32.totalorder (!%p448_p9), %v1563_v9, 17 }
  0x19   : > { %vm570_vm2 = vcmp.lt.s32.totalorder (!%p448_p9), %v1563_v9, 15  ;;  %vm594_vm3 = vcmp.lt.s32.totalorder (!%p448_p9), %v1563_v9, 1  ;;  %vm635_vm4 = vcmp.lt.s32.totalorder (!%p448_p9), %v1563_v9, 127  ;;  %vm659_vm5 = vcmp.lt.s32.totalorder (!%p448_p9), %v1563_v9, 113  ;;  %s1802_s1 = sld [smem:[#allocation9_spill]] (!%p448_p9)  ;;  %s1803_s3 = sld [smem:[#allocation11_spill]] (!%p448_p9) }
  0x1a   : > { %vm683_vm6 = vcmp.lt.s32.totalorder (!%p448_p9), %v1563_v9, 112  ;;  %vm707_vm7 = vcmp.lt.s32.totalorder (!%p448_p9), %v1563_v9, 111  ;;  %vm1014_vm11 = vcmp.eq.s32.totalorder (!%p448_p9), %v1561_v8, %v1563_v9 }
  0x1c   : > { %s1526_s16 = scalar_select %p502_p10, %s1497_s10, 1 }
  0x1e   : > { %s1790_s17 = sshll.u32 %s1526_s16, 4  ;;  %v831_v5 = vld [vmem:[%s1800_s4] sm:$0xff]  ;;  %v1190_v37 = vld [vmem:[%s1801_s2 + $0x8] sm:$0x3]  ;;  %v1191_v41 = vld [vmem:[%s1801_s2 + $0xa] sm:$0x3] }
  0x1f   : > { %s506_s24 = scalar_lea.vmem %s1799_s0, %s1790_s17  ;;  %v1187_v12 = vld [vmem:[%s1801_s2 + $0x2] sm:$0x3]  ;;  %v526_v13 = vld [vmem:[%s1801_s2] sm:$0x3]  ;;  %v1188_v30 = vld [vmem:[%s1801_s2 + $0x4] sm:$0x3]  ;;  %v624_v46 = vrot.slane %v1190_v37, %v1569_v11  ;;  %v620_v47 = vrot.slane %v1190_v37, %v1566_v10  ;;  %v644_v50 = vrot.slane %v1191_v41, %v1566_v10  ;;  %v648_v51 = vrot.slane %v1191_v41, %v1569_v11  ;;  %s514_s0 = scalar_lea.vmem %s1788_s14, %s1526_s16 }
  0x20   : > { %v1534_v1 = vld [vmem:[%s506_s24] sm:$0xff]  ;;  %v1538_v2 = vld [vmem:[%s506_s24 + $0x8] sm:$0xff]  ;;  %s1387_s24 = smov 113   ;;  %v555_v16 = vrot.slane %v1187_v12, %v1566_v10  ;;  %v559_v17 = vrot.slane %v1187_v12, %v1569_v11  ;;  %v531_v18 = vrot.slane %v526_v13, %v1566_v10  ;;  %v535_v19 = vrot.slane %v526_v13, %v1569_v11  ;;  %s1204_s17 = sshll.u32 %s1497_s10, 4 }
  0x21   : > { %542 = vrot.lane.b32.xlu1 %v1534_v1, %s1382_s26  ;;  %517 = vrot.lane.b32.xlu0 %v1534_v1, %s1383_s27  ;;  %v841_v6 = vadd.f32 %v1538_v2, %v1534_v1  ;;  %v1189_v31 = vld [vmem:[%s1801_s2 + $0x6] sm:$0x3]  ;;  %v579_v36 = vrot.slane %v1188_v30, %v1566_v10  ;;  %v583_v38 = vrot.slane %v1188_v30, %v1569_v11 }
  0x22   : > { %v603_v39 = vrot.slane %v1189_v31, %v1566_v10  ;;  %v607_v40 = vrot.slane %v1189_v31, %v1569_v11  ;;  %v628_v60 = vmul.f32 %v624_v46, %v1538_v2  ;;  %v627_v61 = vmul.f32 %v620_v47, %v1534_v1  ;;  %v846_v41 = vld [vmem:[%s1779_s5] sm:$0xff] }
  0x25   : > { %544 = vrot.lane.b32.xlu1 %v1538_v2, %s1382_s26  ;;  %519 = vrot.lane.b32.xlu0 %v1538_v2, %s1383_s27  ;;  %s1391_s26 = smov 111  }
  0x29   : > { %568 = vrot.lane.b32.xlu1 %v1538_v2, %s1384_s28  ;;  %566 = vrot.lane.b32.xlu0 %v1534_v1, %s1384_s28  ;;  %s1390_s28 = smov 112  }
  0x2d   : > { %592 = vrot.lane.b32.xlu1 %v1538_v2, %s1385_s18  ;;  %590 = vrot.lane.b32.xlu0 %v1534_v1, %s1385_s18 }
  0x31   : > { %633 = vrot.lane.b32.xlu1 %v1538_v2, %s1386_s19  ;;  %631 = vrot.lane.b32.xlu0 %v1534_v1, %s1386_s19 }
  0x35   : > { %657 = vrot.lane.b32.xlu1 %v1538_v2, %s1387_s24  ;;  %655 = vrot.lane.b32.xlu0 %v1534_v1, %s1387_s24  ;;  %s1729_s24 = scalar_lea.hbm %s1789_s15, %s1204_s17 }
  0x39   : > { %681 = vrot.lane.b32.xlu1 %v1538_v2, %s1390_s28  ;;  %679 = vrot.lane.b32.xlu0 %v1534_v1, %s1390_s28  ;;  %s500_s28 = sand.u32 1, %s1372_s21  }
  0x3a   : > { %s1705_s18 = scalar_lea.vmem [#allocation4], %s500_s28 }
  0x3d   : > { %705 = vrot.lane.b32.xlu1 %v1538_v2, %s1391_s26  ;;  %703 = vrot.lane.b32.xlu0 %v1534_v1, %s1391_s26  ;;  %s1080_s26 = sshll.u32 %s1705_s18, 4  ;;  %s1081_s26 = int_to_ptr.vmem [resolvable:$true] %s1080_s26 }
  0x41   : > { %834 = vperm.xlu1 %1284, %v831_v5   ;;  %v1192_v5 = vld [vmem:[%s1801_s2 + $0xc] sm:$0x3] }
  0x5c   : > { %842 = vadd.xlane.f32.xlu0 %v841_v6  ;;  %v1193_v6 = vld [vmem:[%s1801_s2 + $0xe] sm:$0x3] }
  0x93   : > { %v543_v14 = vpop.permute.xlu1 %542  ;;  %v518_v15 = vpop.permute.xlu0 %517 }
  0x97   : > { %v545_v20 = vpop.permute.xlu1 %544  ;;  %v520_v21 = vpop.permute.xlu0 %519 }
  0x98   : > { %v547_v22 = vsel %vm546_vm0, %v543_v14, %v545_v20  ;;  %v548_v23 = vsel %vm546_vm0, %v545_v20, %v543_v14  ;;  %v524_v24 = vsel %vm523_vm1, %v518_v15, %v520_v21  ;;  %v525_v25 = vsel %vm523_vm1, %v520_v21, %v518_v15 }
  0x99   : > { %v562_v26 = vmul.f32 %v555_v16, %v548_v23  ;;  %v563_v27 = vmul.f32 %v559_v17, %v547_v22  ;;  %v538_v28 = vmul.f32 %v531_v18, %v525_v25  ;;  %v539_v29 = vmul.f32 %v535_v19, %v524_v24  ;;  %v1194_v19 = vld [vmem:[%s1801_s2 + $0x10] sm:$0x3]  ;;  %s1392_s2 = smov [#allocation4]  }
  0x9a   : > { %v668_v15 = vrot.slane %v1192_v5, %v1566_v10  ;;  %v672_v16 = vrot.slane %v1192_v5, %v1569_v11  ;;  %v692_v17 = vrot.slane %v1193_v6, %v1566_v10  ;;  %v696_v18 = vrot.slane %v1193_v6, %v1569_v11 }
  0x9b   : > { %v569_v32 = vpop.permute.xlu1 %568  ;;  %v567_v33 = vpop.permute.xlu0 %566  ;;  %v1209_v34 = vpack.c.bf16 %v563_v27, %v539_v29  ;;  %v1211_v35 = vpack.c.bf16 %v562_v26, %v538_v28  ;;  %v720_v26 = vrot.slane %v1194_v19, %v1569_v11  ;;  %v716_v31 = vrot.slane %v1194_v19, %v1566_v10 }
  0x9c   : > { %v571_v42 = vsel %vm570_vm2, %v567_v33, %v569_v32  ;;  %v572_v43 = vsel %vm570_vm2, %v569_v32, %v567_v33 }
  0x9d   : > { %1210 = vmatprep.subr.bf16.mxu0 %v1209_v34  ;;  %1225 = vmatprep.subr.bf16.mxu1 %v1209_v34  ;;  %v586_v52 = vmul.f32 %v579_v36, %v572_v43  ;;  %v587_v53 = vmul.f32 %v583_v38, %v571_v42 }
  0x9e   : > { %1212 = vmatpush1.bf16.msra.mxu0 %v1211_v35  ;;  %1230 = vmatpush1.bf16.msra.mxu1 %v1211_v35 }
  0x9f   : > { %v593_v44 = vpop.permute.xlu1 %592  ;;  %v591_v45 = vpop.permute.xlu0 %590 }
  0xa0   : > { %v595_v48 = vsel %vm594_vm3, %v591_v45, %v593_v44  ;;  %v596_v49 = vsel %vm594_vm3, %v593_v44, %v591_v45 }
  0xa1   : > { %v610_v54 = vmul.f32 %v603_v39, %v596_v49  ;;  %v611_v55 = vmul.f32 %v607_v40, %v595_v48  ;;  %v727_v40 = vld [vmem:[%s1802_s1] sm:$0xff] }
  0xa3   : > { %v634_v56 = vpop.permute.xlu1 %633  ;;  %v632_v57 = vpop.permute.xlu0 %631  ;;  %v1213_v58 = vpack.c.bf16 %v611_v55, %v587_v53  ;;  %v1215_v59 = vpack.c.bf16 %v610_v54, %v586_v52  ;;  %v856_v52 = vld [vmem:[%s1780_s6] sm:$0x1] }
  0xa4   : > { %v636_v62 = vsel %vm635_vm4, %v632_v57, %v634_v56  ;;  %v637_v63 = vsel %vm635_vm4, %v634_v56, %v632_v57  ;;  %v861_v56 = vld [vmem:[%s1781_s7 + $0x20] sm:$0xff]  ;;  %v862_v57 = vld [vmem:[%s1781_s7 + $0x28] sm:$0xff] }
  0xa5   : > { %v651_v0 = vmul.f32 %v644_v50, %v636_v62  ;;  %v652_v4 = vmul.f32 %v648_v51, %v637_v63  ;;  %1214 = vmatprep.subr.bf16.mxu0 %v1213_v58  ;;  %1226 = vmatprep.subr.bf16.mxu1 %v1213_v58 }
  0xa6   : > { %1216 = vmatpush1.bf16.msra.mxu0 %v1215_v59  ;;  %1231 = vmatpush1.bf16.msra.mxu1 %v1215_v59 }
  0xa7   : > { %v658_v7 = vpop.permute.xlu1 %657  ;;  %v656_v12 = vpop.permute.xlu0 %655  ;;  %v1217_v13 = vpack.c.bf16 %v652_v4, %v628_v60  ;;  %v1219_v14 = vpack.c.bf16 %v651_v0, %v627_v61  ;;  %v860_v60 = vld [vmem:[%s1781_s7 + $0x8] sm:$0xff]  ;;  %v859_v61 = vld [vmem:[%s1781_s7] sm:$0xff]  ;;  %v864_v4 = vld [vmem:[%s1781_s7 + $0x38] sm:$0xff] }
  0xa8   : > { %v660_v20 = vsel %vm659_vm5, %v656_v12, %v658_v7  ;;  %v661_v21 = vsel %vm659_vm5, %v658_v7, %v656_v12  ;;  %v863_v12 = vld [vmem:[%s1781_s7 + $0x30] sm:$0xff] }
  0xa9   : > { %1218 = vmatprep.subr.bf16.mxu0 %v1217_v13  ;;  %1227 = vmatprep.subr.bf16.mxu1 %v1217_v13  ;;  %v675_v27 = vmul.f32 %v668_v15, %v660_v20  ;;  %v676_v28 = vmul.f32 %v672_v16, %v661_v21 }
  0xaa   : > { %1220 = vmatpush1.bf16.msra.mxu0 %v1219_v14  ;;  %1232 = vmatpush1.bf16.msra.mxu1 %v1219_v14 }
  0xab   : > { %v682_v22 = vpop.permute.xlu1 %681  ;;  %v680_v23 = vpop.permute.xlu0 %679 }
  0xac   : > { %v684_v24 = vsel %vm683_vm6, %v680_v23, %v682_v22  ;;  %v685_v25 = vsel %vm683_vm6, %v682_v22, %v680_v23 }
  0xad   : > { %v699_v29 = vmul.f32 %v692_v17, %v684_v24  ;;  %v700_v30 = vmul.f32 %v696_v18, %v685_v25  ;;  %v980_v18 = vld [vmem:[%s1803_s3] sm:$0x3]  ;;  %s1322_s3 = sshll.u32 %s1392_s2, 4  ;;  %s1323_s3 = int_to_ptr.vmem [resolvable:$false] %s1322_s3 }
  0xae   : > { %v985_v21 = vrot.slane %v980_v18, %v1566_v10  ;;  %v989_v24 = vrot.slane %v980_v18, %v1569_v11  ;;  %s1324_s4 = scalar_lea.vmem %s1323_s3, 32  ;;  %p1325_p0 = scmp.lt.s32.totalorder %s1081_s26, %s1323_s3 }
  0xaf   : > { %v706_v32 = vpop.permute.xlu1 %705  ;;  %v704_v33 = vpop.permute.xlu0 %703  ;;  %v1221_v34 = vpack.c.bf16 %v700_v30, %v676_v28  ;;  %v1223_v35 = vpack.c.bf16 %v699_v29, %v675_v27  ;;  %v728_v30 = vld [vmem:[%s1802_s1 + $0x8] sm:$0xff]  ;;  %s1318_s1 = scalar_lea.vmem %s1081_s26, 16 }
  0xb0   : > { %v708_v36 = vsel %vm707_vm7, %v704_v33, %v706_v32  ;;  %v709_v37 = vsel %vm707_vm7, %v706_v32, %v704_v33  ;;  %v895_v32 = vld [vmem:[%s1782_s8 + $0x20] sm:$0xff]  ;;  %p1319_p11 = scmp.ne.s32.totalorder %s1081_s26, %s1318_s1  ;;  %p1326_p1 = scmp.lt.s32.totalorder %s1324_s4, %s1318_s1 }
  0xb1   : > { %v724_v38 = vmul.f32 %v720_v26, %v709_v37  ;;  %1222 = vmatprep.subr.bf16.mxu0 %v1221_v34  ;;  %1228 = vmatprep.subr.bf16.mxu1 %v1221_v34  ;;  %v723_v39 = vmul.f32 %v716_v31, %v708_v36 }
  0xb2   : > { %1224 = vmatpush1.bf16.msra.mxu0 %v1223_v35  ;;  %1233 = vmatpush1.bf16.msra.mxu1 %v1223_v35  ;;  %v893_v35 = vld [vmem:[%s1782_s8] sm:$0xff]  ;;  %p1320_p12 = pnand %p1319_p11, %p1514_p5  ;;  %p1327_p2 = por %p1326_p1, %p1325_p0 }
  0xb3   : > { %770 = vmatprep.subr.mxu0 %v724_v38  ;;  %1229 = vmatprep.subr.mxu1 %v724_v38 }
  0xb4   : > { %p1321_p13 = pneg %p1320_p12 }
  0xb6   : > { %771 = vmatpush1.msra.mxu0 %v723_v39  ;;  %1234 = vmatpush1.msra.mxu1 %v723_v39  ;;  %p1328_p3 = pnand %p1327_p2, %p1321_p13 }
  0xb7   : > { %1195 = vmatmul.mubr.msk.f32.vlgmr.msra.gmra.mrb[0].mxu0 %vm747_vm8, %v727_v40  ;;  %1196 = vmatmul.mubr.msk.f32.vlgmr.msra.gmra.mrb[0].mxu1 %vm747_vm8, %v728_v30 }
  0xc0   : > { %v835_v17 = vpop.permute.xlu1 %834 }
  0xe9   : > { %v843_v42 = vpop.xlane.xlu0 %842 }
  0xea   : > { %v845_v43 = vmul.f32 0.00390625, %v843_v42 }
  0xec   : > { %v847_v44 = vmul.f32 %v846_v41, %v845_v43  ;;  %v896_v41 = vld [vmem:[%s1782_s8 + $0x28] sm:$0xff] }
  0xee   : > { %v849_v45 = vsel %vm848_vm9, %v847_v44, 0.0 }
  0xef   : > { %v850_v46 = vrot.slane %v849_v45, 4 }
  0xf1   : > { %v851_v47 = vadd.f32 %v850_v46, %v849_v45 }
  0xf3   : > { %v852_v48 = vrot.slane %v851_v47, 2 }
  0xf5   : > { %v853_v49 = vadd.f32 %v852_v48, %v851_v47 }
  0xf7   : > { %v854_v50 = vrot.slane %v853_v49, 1 }
  0xf9   : > { %v855_v51 = vadd.f32 %v854_v50, %v853_v49  ;;  %v997_v49 = vld [vmem:[%s1785_s11] sm:$0xff] }
  0xfb   : > { %v857_v53 = vadd.f32 %v856_v52, %v855_v51 }
  0xfd   : > { %v858_v54 = vmax.f32 %v857_v53, 0.0  ;;  %v894_v53 = vld [vmem:[%s1782_s8 + $0x8] sm:$0xff] }
  0xff   : > { %v868_v55 = vrot.slane %v858_v54, %v1566_v10 }
 0x101   : > { %v871_v58 = vmul.f32 %v868_v55, %v861_v56  ;;  %v872_v59 = vmul.f32 %v868_v55, %v862_v57  ;;  %v870_v62 = vmul.f32 %v868_v55, %v860_v60  ;;  %v869_v6 = vmul.f32 %v868_v55, %v859_v61 }
 0x102   : > { %v874_v7 = vmul.f32 %v868_v55, %v864_v4  ;;  %v873_v15 = vmul.f32 %v868_v55, %v863_v12 }
 0x103   : > { %v881_v63 = vsel %vm848_vm9, %v871_v58, 0.0  ;;  %v878_v0 = vsel %vm848_vm9, %v870_v62, 0.0  ;;  %v884_v5 = vsel %vm848_vm9, %v872_v59, 0.0  ;;  %v875_v14 = vsel %vm848_vm9, %v869_v6, 0.0 }
 0x104   : > { %882 = vadd.xlane.f32.xlu0 %v881_v63  ;;  %v890_v13 = vsel %vm848_vm9, %v874_v7, 0.0  ;;  %v887_v16 = vsel %vm848_vm9, %v873_v15, 0.0 }
 0x108   : > { %885 = vadd.xlane.f32.xlu0 %v884_v5 }
 0x10c   : > { %876 = vadd.xlane.f32.xlu0 %v875_v14 }
 0x110   : > { %888 = vadd.xlane.f32.xlu0 %v887_v16 }
 0x18a   : > { %v820_v19 = vpop.f32.mrb[0].mxu0 }
 0x18b   : > { %v837_v20 = vadd.f32 %v835_v17, %v820_v19  ;;  %v822_v22 = vpop.f32.mrb[1].mxu0 }
 0x18c   : > { %v838_v23 = vadd.f32 %v835_v17, %v822_v22  ;;  %v897_v17 = vld [vmem:[%s1782_s8 + $0x30] sm:$0xff] }
 0x18d   : > { %v839_v25 = vmax.f32 %v837_v20, 0.0  ;;  %v1203_v20 = vsel %vm1014_vm11, 1.0, %v1388_v3 }
 0x18e   : > { %v840_v26 = vmax.f32 %v838_v23, 0.0 }
 0x18f   : > { %v992_v27 = vmul.f32 %v985_v21, %v839_v25 }
 0x190   : > { %v993_v28 = vmul.f32 %v989_v24, %v840_v26 }
 0x191   : > { %v883_v31 = vpop.xlane.xlu0 %882 }
 0x192   : > { %v994_v29 = vadd.f32 %v993_v28, %v992_v27  ;;  %v901_v33 = vadd.f32 %v895_v32, %v883_v31  ;;  %v898_v27 = vld [vmem:[%s1782_s8 + $0x38] sm:$0xff] }
 0x194   : > { %995 = vadd.xlane.f32.xlu1 %v994_v29  ;;  %v917_v34 = vmul.f32 -2.0, %v901_v33 }
 0x195   : > { %v886_v11 = vpop.xlane.xlu0 %885 }
 0x196   : > { %v919_v37 = vmul.f32 1.442695, %v917_v34  ;;  %v902_v43 = vadd.f32 %v896_v41, %v886_v11 }
 0x198   : > { %879 = vadd.xlane.f32.xlu1 %v878_v0  ;;  %1286 = vpow2.f32 %v919_v37  ;;  %v918_v45 = vmul.f32 -2.0, %v902_v43 }
 0x199   : > { %v877_v36 = vpop.xlane.xlu0 %876 }
 0x19a   : > { %v899_v38 = vadd.f32 %v893_v35, %v877_v36  ;;  %v921_v47 = vmul.f32 1.442695, %v918_v45 }
 0x19c   : > { %891 = vadd.xlane.f32.xlu1 %v890_v13  ;;  %v905_v39 = vsub.f32 0.0, %v899_v38  ;;  %v1007_v13 = vld [vmem:[%s1786_s12] sm:$0x1] }
 0x19d   : > { %v889_v18 = vpop.xlane.xlu0 %888 }
 0x19e   : > { %v907_v40 = vmul.f32 1.442695, %v905_v39  ;;  %v903_v22 = vadd.f32 %v897_v17, %v889_v18 }
 0x1a0   : > { %1288 = vpow2.f32 %v907_v40  ;;  %v931_v29 = vsub.f32 0.0, %v903_v22 }
 0x1a2   : > { %v1287_v42 = vpop.eup %1286  ;;  %v933_v32 = vmul.f32 1.442695, %v931_v29 }
 0x1a3   : > { %v923_v44 = vadd.f32 1.0, %v1287_v42 }
 0x1a5   : > { %1290 = vrcp.f32 %v923_v44 }
 0x1a6   : > { %1292 = vpow2.f32 %v921_v47 }
 0x1aa   : > { %v1289_v46 = vpop.eup %1288 }
 0x1ab   : > { %v911_v48 = vadd.f32 1.0, %v1289_v46 }
 0x1ad   : > { %1294 = vrcp.f32 %v911_v48 }
 0x1af   : > { %v1291_v52 = vpop.eup %1290 }
 0x1b0   : > { %v926_v57 = vmul.f32 2.0, %v1291_v52  ;;  %v1293_v60 = vpop.eup %1292 }
 0x1b1   : > { %v924_v5 = vadd.f32 1.0, %v1293_v60 }
 0x1b2   : > { %v1197_v63 = vadd.f32 -1.0, %v926_v57 }
 0x1b7   : > { %v1295_v4 = vpop.eup %1294 }
 0x1b8   : > { %v943_v12 = vmul.f32 %v1295_v4, %v1197_v63 }
 0x1ba   : > { %v945_v16 = vmul.f32 -2.0, %v943_v12  ;;  %v975_v12 = vld [vmem:[#allocation3] sm:$0x1] }
 0x1bc   : > { %v947_v9 = vmul.f32 1.442695, %v945_v16  ;;  %v826_v16 = vpop.f32.mrb[0].mxu1 }
 0x1bd   : > { %v828_v17 = vpop.f32.mrb[1].mxu1 }
 0x221   : > { %v996_v50 = vpop.xlane.xlu1 %995 }
 0x222   : > { %v998_v51 = vmul.f32 %v997_v49, %v996_v50 }
 0x224   : > { %v1000_v54 = vsel %vm999_vm10, %v998_v51, 0.0 }
 0x225   : > { %v880_v55 = vpop.xlane.xlu1 %879  ;;  %v1001_v56 = vrot.slane %v1000_v54, 4 }
 0x226   : > { %v900_v58 = vadd.f32 %v894_v53, %v880_v55  ;;  %v961_v53 = vld [vmem:[%s1783_s9] sm:$0xff] }
 0x227   : > { %v1002_v59 = vadd.f32 %v1001_v56, %v1000_v54 }
 0x228   : > { %v906_v61 = vsub.f32 0.0, %v900_v58  ;;  %v962_v58 = vld [vmem:[%s1783_s9 + $0x8] sm:$0xff] }
 0x229   : > { %v1003_v62 = vrot.slane %v1002_v59, 2  ;;  %v892_v28 = vpop.xlane.xlu1 %891 }
 0x22a   : > { %v909_v0 = vmul.f32 1.442695, %v906_v61  ;;  %v904_v31 = vadd.f32 %v898_v27, %v892_v28 }
 0x22b   : > { %v1004_v6 = vadd.f32 %v1003_v62, %v1002_v59 }
 0x22c   : > { %1296 = vpow2.f32 %v909_v0  ;;  %v932_v33 = vsub.f32 0.0, %v904_v31 }
 0x22d   : > { %v1005_v7 = vrot.slane %v1004_v6, 1  ;;  %1298 = vrcp.f32 %v924_v5 }
 0x22e   : > { %v935_v37 = vmul.f32 1.442695, %v932_v33 }
 0x22f   : > { %v1006_v14 = vadd.f32 %v1005_v7, %v1004_v6 }
 0x231   : > { %v1008_v15 = vadd.f32 %v1007_v13, %v1006_v14 }
 0x233   : > { %vm1009_vm13 = vcmp.gt.f32.partialorder %v1008_v15, 0.0 }
 0x234   : > { %v1202_v19 = vsel %vm1009_vm13, 1.0, %v1388_v3 }
 0x235   : > { %v1020_v21 = vrot.slane %v1202_v19, %v1566_v10  ;;  %1052 = vst.msk [vmem:[%s1705_s18] sm:$0x1] %vm1051_vm12, %v1202_v19 }
 0x236   : > { %v1297_v8 = vpop.eup %1296 }
 0x237   : > { %v912_v23 = vadd.f32 1.0, %v1297_v8  ;;  %v1021_v24 = vmul.f32 %v1203_v20, %v1020_v21  ;;  %v1299_v25 = vpop.eup %1298 }
 0x238   : > { %v928_v30 = vmul.f32 2.0, %v1299_v25 }
 0x239   : > { %1300 = vrcp.f32 %v912_v23  ;;  %v1022_v26 = vsel %vm999_vm10, %v1021_v24, 0.0 }
 0x23a   : > { %1302 = vpow2.f32 %v947_v9  ;;  %1023 = vadd.xlane.f32.xlu0 %v1022_v26  ;;  %v1198_v11 = vadd.f32 -1.0, %v928_v30 }
 0x23b   : > { %1304 = vpow2.f32 %v933_v32 }
 0x23c   : > { %1306 = vpow2.f32 %v935_v37 }
 0x243   : > { %v1301_v34 = vpop.eup %1300 }
 0x244   : > { %v1303_v35 = vpop.eup %1302  ;;  %v944_v36 = vmul.f32 %v1301_v34, %v1198_v11 }
 0x245   : > { %v951_v39 = vadd.f32 1.0, %v1303_v35  ;;  %v1305_v41 = vpop.eup %1304 }
 0x246   : > { %v946_v38 = vmul.f32 -2.0, %v944_v36  ;;  %v937_v42 = vadd.f32 1.0, %v1305_v41  ;;  %v1307_v43 = vpop.eup %1306 }
 0x247   : > { %v938_v47 = vadd.f32 1.0, %v1307_v43 }
 0x248   : > { %v949_v40 = vmul.f32 1.442695, %v946_v38 }
 0x24a   : > { %1308 = vpow2.f32 %v949_v40 }
 0x24b   : > { %1310 = vrcp.f32 %v951_v39 }
 0x24c   : > { %1312 = vrcp.f32 %v937_v42 }
 0x254   : > { %v1309_v44 = vpop.eup %1308 }
 0x255   : > { %v1311_v45 = vpop.eup %1310  ;;  %v952_v46 = vadd.f32 1.0, %v1309_v44 }
 0x256   : > { %v954_v48 = vmul.f32 2.0, %v1311_v45  ;;  %v1313_v50 = vpop.eup %1312 }
 0x257   : > { %1314 = vrcp.f32 %v952_v46 }
 0x258   : > { %1316 = vrcp.f32 %v938_v47  ;;  %v1199_v49 = vadd.f32 -1.0, %v954_v48 }
 0x25a   : > { %v959_v51 = vmul.f32 %v1313_v50, %v1199_v49 }
 0x25c   : > { %v963_v57 = vmul.f32 %v961_v53, %v959_v51 }
 0x25e   : > { %v966_v60 = vsel %vm965_vm14, %v963_v57, 0.0 }
 0x261   : > { %v1315_v52 = vpop.eup %1314 }
 0x262   : > { %v956_v54 = vmul.f32 2.0, %v1315_v52  ;;  %v1317_v55 = vpop.eup %1316 }
 0x264   : > { %v1200_v56 = vadd.f32 -1.0, %v956_v54 }
 0x266   : > { %v960_v59 = vmul.f32 %v1317_v55, %v1200_v56 }
 0x268   : > { %v964_v61 = vmul.f32 %v962_v58, %v960_v59 }
 0x26a   : > { %v967_v62 = vsel %vm965_vm14, %v964_v61, 0.0 }
 0x26b   : > { %v968_v63 = vadd.f32 %v967_v62, %v966_v60 }
 0x26d   : > { %v969_v0 = vrot.slane %v968_v63, 4 }
 0x26f   : > { %v970_v4 = vadd.f32 %v969_v0, %v968_v63 }
 0x271   : > { %v971_v5 = vrot.slane %v970_v4, 2 }
 0x273   : > { %v972_v6 = vadd.f32 %v971_v5, %v970_v4 }
 0x275   : > { %v973_v7 = vrot.slane %v972_v6, 1 }
 0x277   : > { %v974_v13 = vadd.f32 %v973_v7, %v972_v6 }
 0x279   : > { %v976_v14 = vadd.f32 %v975_v12, %v974_v13 }
 0x27b   : > { %vm977_vm0 = vcmp.gt.f32.partialorder %v976_v14, 0.0 }
 0x27c   : > { %v1201_v15 = vsel %vm977_vm0, 1.0, %v1388_v3 }
 0x27d   : > { %1050 = vst.msk [vmem:[%s514_s0] sm:$0x1] %vm1049_vm15, %v1201_v15  ;;  %v1028_v18 = vrot.slane %v1201_v15, %v1566_v10  ;;  %s1062_s0 = scalar_lea.sflag [#allocation5], %s500_s28 }
 0x2c7   : > { %v1024_v19 = vpop.xlane.xlu0 %1023 }
 0x2c8   : > { %v1029_v20 = vmul.f32 %v1028_v18, %v1024_v19 }
 0x2ca   : > { %v1037_v21 = vsub.f32 1.0, %v1029_v20  ;;  %1032 = vperm.xlu1 %1284, %v1029_v20  }
 0x2cc   : > { %1040 = vperm.xlu0 %1285, %v1037_v21  }
 0x2cd   : > { %1331 = shalt.err (!%p1328_p3)
}
 0x2ce   : > { %s1332_s10 = scalar_lea.hbm %s1729_s24, 16  ;;  %s1336_s2 = scalar_lea.hbm %s1789_s15, 32 }
 0x2cf   : > { %p1333_p4 = scmp.ne.s32.totalorder %s1729_s24, %s1332_s10  ;;  %p1337_p9 = scmp.lt.u32.totalorder %s1729_s24, %s1789_s15 }
 0x2d0   : > { %p1338_p10 = scmp.lt.u32.totalorder %s1336_s2, %s1332_s10  ;;  %p1340_p12 = scmp.lt.u32.totalorder %s1332_s10, %s1729_s24 }
 0x2d1   : > { %p1334_p7 = pnand %p1333_p4, %p1514_p5 }
 0x2d2   : > { %p1339_p11 = por %p1338_p10, %p1337_p9 }
 0x2d3   : > { %p1335_p8 = pneg %p1334_p7 }
 0x2d4   : > { %p1341_p13 = por %p1340_p12, %p1339_p11 }
 0x2d6   : > { %p1342_p0 = pnand %p1341_p13, %p1335_p8 }
 0x2d8   : > { %1345 = shalt.err (!%p1342_p0)
}
 0x2d9   : > { %1235 = dma.vmem_to_hbm [thread:$0]  (%p1514_p5), %s1081_s26, 16, %s1729_s24, %s1062_s0  }
 0x2da   : > { %s1804_s1 = sshll.u32 %s1526_s16, 4 }
 0x2db   : > { %s511_s19 = scalar_lea.vmem %s1787_s13, %s1804_s1 }
 0x349   : > { %v1033_v3 = vpop.permute.xlu1 %1032 }
 0x34a   : > { %v1035_v8 = vmul.f32 %v1033_v3, %v826_v16  ;;  %v1036_v9 = vmul.f32 %v1033_v3, %v828_v17 }
 0x34b   : > { %v1041_v10 = vpop.permute.xlu0 %1040 }
 0x34c   : > { %v1043_v22 = vmul.f32 %v1041_v10, %v1534_v1  ;;  %v1044_v23 = vmul.f32 %v1041_v10, %v1538_v2 }
 0x34e   : > { %v1045_v24 = vadd.f32 %v1043_v22, %v1035_v8  ;;  %v1046_v25 = vadd.f32 %v1044_v23, %v1036_v9 }
 0x350   : > { %1047 = vst [vmem:[%s511_s19] sm:$0xff] %v1045_v24  ;;  %1048 = vst [vmem:[%s511_s19 + $0x8] sm:$0xff] %v1046_v25 }
 0x351 PF: > { %p1241_p5 = scmp.ge.s32.totalorder %s1380_s23, 2  ;;  %s1106_s29 = sand.u32 1, %s1368_s20  }
 0x352   : > { %s1107_s26 = scalar_lea.sflag [#allocation5], %s1106_s29 }
 0x353   : > { %p1238_p1 = pnand %p1241_p5, %p1518_p6 }
 0x355   : > { %1363 = dma.done.wait (!%p1238_p1), %s1107_s26, 16  }
 0x356   : > { %1365 = vsyncadd (!%p1238_p1), %s1107_s26, 4294967280  ;;  %s1805_s16 = sld [smem:[#allocation7_spill]]  ;;  %p28_p2 = scmp.ge.s32.totalorder %s1501_s25, 4  }
 0x357   : > { %s1806_s20 = smov %s1372_s21  ;;  %s1807_s21 = smov %s1376_s22 }
 0x358   : > { %s1809_s23 = smov %s1501_s25  ;;  %30 = sbr.rel (!%p28_p2) target bundleno = 9 (0x9), region = 139 }
 0x35c   : > { %s1808_s22 = smov %s1805_s16 }
 0x35f   :  { %1111 = vsyncpa [#allocation5], 1 }
 0x360   :  { %1113 = vsyncpa [#allocation5 + $0x1], 1 }

</bundles_post_ra>
